<compile_context>
chip_gen: v7x
topology: tpu7x:2x2x1
jax: 0.10.0
libtpu: 0.0.40
codegen_flags: <defaults>
</compile_context>

<pallas_src>
import functools

import jax
import jax.numpy as jnp
from jax import lax
from jax.experimental import pallas as pl
from jax.experimental.pallas import tpu as pltpu


def _cosface_kernel(logits_ref, lab_ref, out_ref, *, s, margin, block_n):
    # logits_ref: (bm, bn) tile of the logits matrix.
    # lab_ref:    (bm, 1) int32 labels for these rows (-1 = ignore row).
    x = logits_ref[...].astype(jnp.float32)
    x = jnp.clip(x, -1.0 + 1e-7, 1.0 - 1e-7)

    lab = lab_ref[...]                                        # (bm, 1)
    col0 = pl.program_id(1) * block_n                         # absolute column offset
    col = col0 + lax.broadcasted_iota(jnp.int32, x.shape, 1)  # (bm, bn)
    is_target = jnp.logical_and(col == lab, lab != -1)        # broadcast compare (VPU)

    out = jnp.where(is_target, x - margin, x) * s
    out_ref[...] = out.astype(out_ref.dtype)


def _round_down(x, m):
    return max(m, (x // m) * m)


def _round_up(x, m):
    return ((x + m - 1) // m) * m


def _device_tile_budget():
    """Per-buffer VMEM byte budget and vmem_limit override per TPU generation."""
    kind = ""
    try:
        kind = jax.devices()[0].device_kind.lower()
    except Exception:
        pass
    if "v6" in kind:
        # v6e: 128 MiB physical, 32 MiB scoped default -> raise limit, 8 MiB tiles
        # (in+out double-buffered ~= 32 MiB).
        return 8 << 20, 64 << 20
    if "v7" in kind or "7x" in kind or "tpu7" in kind:
        # v7x: 64 MiB physical, 32 MiB scoped default.  6 MiB/buffer keeps the
        # double-buffered in+out footprint ~24 MiB (within the default); the
        # explicit limit just adds headroom without reusing a v6e-sized config.
        return 6 << 20, 40 << 20
    # v5e / unknown: stay under the 16 MiB default scoped VMEM (8 MiB total).
    return 2 << 20, None


def _pick_tiles(n, c, itemsize, budget_bytes):
    """Pick (bm, bn): lane-dense, dtype-aware, budget-sized, grid-splittable."""
    sub = 16 if itemsize == 2 else 8           # bf16 packs 16 sublanes per vreg
    budget_elems = max(budget_bytes // itemsize, sub * 128)

    # Lane (class) dim: prefer full rows (one contiguous strip per row) when C
    # fits; otherwise the widest 128-multiple the budget allows (cap 8192).
    if c <= 8192 and c * sub <= budget_elems:
        bn = c
    else:
        bn = min(_round_up(c, 128), _round_down(budget_elems // sub, 128), 8192)

    # Sublane (row) dim: fill the rest of the budget.
    bm = _round_down(budget_elems // bn, sub)
    bm = min(bm, _round_up(n, sub))
    if n <= bm:
        bm = n                                  # full dim is always legal

    # Keep >= 2 grid steps over rows when possible so v7x megacore has work to
    # shard across both TensorCores.
    if pl.cdiv(n, bm) * pl.cdiv(c, bn) < 2 and n >= 2 * sub:
        bm = _round_up(pl.cdiv(n, 2), sub)
    return bm, bn


def cosface_pallas(logits, labels, *, s=64.0, margin=0.4):
    """Forward of CosFace. Returns (scaled_logits, None) like the torch module."""
    n, c = logits.shape
    itemsize = jnp.dtype(logits.dtype).itemsize
    labels_col = labels.astype(jnp.int32).reshape(n, 1)

    budget_bytes, vmem_limit = _device_tile_budget()
    bm, bn = _pick_tiles(n, c, itemsize, budget_bytes)
    grid = (pl.cdiv(n, bm), pl.cdiv(c, bn))

    kernel = functools.partial(_cosface_kernel, s=float(s), margin=float(margin),
                               block_n=bn)

    compiler_kwargs = dict(dimension_semantics=("parallel", "parallel"))
    if vmem_limit is not None:
        compiler_kwargs["vmem_limit_bytes"] = int(vmem_limit)

    cost = pl.CostEstimate(
        flops=5 * n * c,                                   # clip/cmp/where/sub/mul
        transcendentals=0,
        bytes_accessed=2 * n * c * itemsize + 4 * n,       # read+write logits, labels
    )

    out = pl.pallas_call(
        kernel,
        out_shape=jax.ShapeDtypeStruct((n, c), logits.dtype),
        grid_spec=pltpu.PrefetchScalarGridSpec(
            num_scalar_prefetch=0,
            grid=grid,
            in_specs=[
                pl.BlockSpec((bm, bn), lambda i, j: (i, j)),   # logits tile
                pl.BlockSpec((bm, 1), lambda i, j: (i, 0)),    # row labels
            ],
            out_specs=pl.BlockSpec((bm, bn), lambda i, j: (i, j)),
        ),
        compiler_params=pltpu.CompilerParams(**compiler_kwargs),
        cost_estimate=cost,
    )(logits, labels_col)
    return out, None


def cosface_ref(logits, labels, s=64.0, margin=0.4):
    """Pure-JAX reference mirroring the PyTorch forward."""
    x = jnp.clip(logits.astype(jnp.float32), -1.0 + 1e-7, 1.0 - 1e-7)
    col = jnp.arange(x.shape[1], dtype=jnp.int32)[None, :]
    lab = labels.astype(jnp.int32)[:, None]
    is_target = jnp.logical_and(col == lab, lab != -1)
    return (jnp.where(is_target, x - margin, x) * s).astype(logits.dtype)


if __name__ == "__main__":
    N, C = 16, 128   # small shapes: 16 samples, 128 classes
    key = jax.random.PRNGKey(0)
    k_log, k_lab = jax.random.split(key)

    # Cosine-similarity style logits in (-1, 1).
    logits = jax.random.uniform(k_log, (N, C), dtype=jnp.float32,
                                minval=-1.0, maxval=1.0)
    labels = jax.random.randint(k_lab, (N,), 0, C, dtype=jnp.int32)
    labels = labels.at[3].set(-1).at[7].set(-1)   # exercise the ignore-index path

    out, aux = cosface_pallas(logits, labels, s=64.0, margin=0.4)
    out = jax.block_until_ready(out)
    assert aux is None

    ref = cosface_ref(logits, labels, s=64.0, margin=0.4)
    assert out.shape == (N, C)
    assert jnp.allclose(out, ref, rtol=1e-6, atol=1e-6), (
        float(jnp.max(jnp.abs(out - ref))))
    print("KERNEL_OK")
</pallas_src>

<mosaic_0001>
module attributes {stable_mosaic.version = 11 : i64} {
  func.func @_cosface_kernel(%arg0: i32, %arg1: i32, %arg2: memref<8x128xf32, #tpu.memory_space<vmem>>, %arg3: memref<8x1xi32, #tpu.memory_space<vmem>>, %arg4: memref<8x128xf32, #tpu.memory_space<vmem>>) attributes {dimension_semantics = [#tpu.dimension_semantics<parallel>, #tpu.dimension_semantics<parallel>], iteration_bounds = array<i64: 2, 1>, scalar_prefetch = 0 : i64, scratch_operands = 0 : i64, tpu.core_type = #tpu.core_type<tc>, window_params = [{transform_indices = @transform_0, window_bounds = array<i64: 8, 128>}, {transform_indices = @transform_1, window_bounds = array<i64: 8, 1>}, {transform_indices = @transform_2, window_bounds = array<i64: 8, 128>}]} {
    %c0 = arith.constant 0 : index
    %c0_0 = arith.constant 0 : index
    %0 = vector.load %arg2[%c0, %c0_0] : memref<8x128xf32, #tpu.memory_space<vmem>>, vector<8x128xf32>
    %cst = arith.constant -0.99999988 : f32
    %cst_1 = arith.constant 0.99999988 : f32
    %1 = vector.broadcast %cst : f32 to vector<8x128xf32>
    %2 = arith.maximumf %1, %0 : vector<8x128xf32>
    %3 = vector.broadcast %cst_1 : f32 to vector<8x128xf32>
    %4 = arith.minimumf %3, %2 : vector<8x128xf32>
    %c0_2 = arith.constant 0 : index
    %c0_3 = arith.constant 0 : index
    %5 = vector.load %arg3[%c0_2, %c0_3] : memref<8x1xi32, #tpu.memory_space<vmem>>, vector<8x1xi32>
    %c128_i32 = arith.constant 128 : i32
    %6 = arith.muli %arg1, %c128_i32 : i32
    %7 = tpu.iota {dimensions = array<i32: 1>} : vector<8x128xi32>
    %8 = vector.broadcast %6 : i32 to vector<8x128xi32>
    %9 = arith.addi %8, %7 : vector<8x128xi32>
    %10 = vector.broadcast %5 : vector<8x1xi32> to vector<8x128xi32>
    %11 = arith.cmpi eq, %9, %10 : vector<8x128xi32>
    %c-1_i32 = arith.constant -1 : i32
    %12 = vector.broadcast %c-1_i32 : i32 to vector<8x1xi32>
    %13 = arith.cmpi ne, %5, %12 : vector<8x1xi32>
    %14 = vector.broadcast %13 : vector<8x1xi1> to vector<8x128xi1>
    %15 = arith.andi %11, %14 : vector<8x128xi1>
    %cst_4 = arith.constant 4.000000e-01 : f32
    %16 = vector.broadcast %cst_4 : f32 to vector<8x128xf32>
    %17 = arith.subf %4, %16 : vector<8x128xf32>
    %18 = arith.select %15, %17, %4 : vector<8x128xi1>, vector<8x128xf32>
    %cst_5 = arith.constant 6.400000e+01 : f32
    %19 = vector.broadcast %cst_5 : f32 to vector<8x128xf32>
    %20 = arith.mulf %18, %19 : vector<8x128xf32>
    %c0_6 = arith.constant 0 : index
    %c0_7 = arith.constant 0 : index
    %21 = vector.load %arg4[%c0_6, %c0_7] : memref<8x128xf32, #tpu.memory_space<vmem>>, vector<8x128xf32>
    tpu.vector_store %arg4[%c0_6, %c0_7], %20 {strides = array<i32>} : memref<8x128xf32, #tpu.memory_space<vmem>>, vector<8x128xf32>,
    return
  }
  func.func @transform_0(%arg0: i32, %arg1: i32) -> (i32, i32) {
    %c0_i32 = arith.constant 0 : i32
    return %arg0, %arg1 : i32, i32
  }
  func.func @transform_1(%arg0: i32, %arg1: i32) -> (i32, i32) {
    %c0_i32 = arith.constant 0 : i32
    %c0_i32_0 = arith.constant 0 : i32
    return %arg0, %c0_i32 : i32, i32
  }
  func.func @transform_2(%arg0: i32, %arg1: i32) -> (i32, i32) {
    %c0_i32 = arith.constant 0 : i32
    return %arg0, %arg1 : i32, i32
  }
}

</mosaic_0001>

<bundles_post_ra>
// kernel: tpu_custom_call.1
= control target key start
LH: loop header
LB: loop body
LE: loop exit
PB: predicated region body
PF: predicated region fallthrough
CT: control target
= control target key end

     0   :  { %7 = vsyncpa [#allocation3], 0  ;;  %s586_s0 = inlined_call_operand.vmem [shape: f32[16,128], index: 0, kind: input, shape index: {}]   ;;  %s587_s1 = inlined_call_operand.vmem [shape: s32[16,1], index: 1, kind: input, shape index: {}]   ;;  %s588_s2 = inlined_call_operand.hbm [shape: f32[16,128], index: 2, kind: output, shape index: {}]  }
   0x1   :  { %9 = vsyncpa [#allocation3 + $0x1], 0  ;;  %s471_s9 = smov 0   ;;  %s473_s10 = smov 0  }
   0x2   :  { %s475_s11 = smov 0   ;;  %s477_s12 = smov 0  }
   0x3   :  { %s479_s13 = smov 0   ;;  %s481_s14 = smov 0  }
   0x4 LB: > { %s303_s15 = sadd.s32 4294967295, %s452_s14   ;;  %s304_s16 = sadd.s32 4294967294, %s452_s14   ;;  %s452_s14 = sphi %s481_s14, %s15_s14   ;;  %s448_s13 = sphi %s479_s13, %s595_s13   ;;  %s444_s12 = sphi %s477_s12, %s594_s12   ;;  %s440_s11 = sphi %s475_s11, %s593_s11   ;;  %s436_s10 = sphi %s473_s10, %s592_s10   ;;  %s432_s9 = sphi %s471_s9, %s591_s9  }
   0x5   : > { %s27_s17 = sadd.s32 1, %s448_s13  ;;  %s90_s18 = sadd.s32 1, %s440_s11 }
   0x6   : > { %p29_p0 = scmp.ge.s32.totalorder %s27_s17, 2  ;;  %p100_p1 = scmp.ne.s32.totalorder %s440_s11, %s436_s10 }
   0x7   : > { %p101_p2 = scmp.eq.s32.totalorder %s303_s15, 1  ;;  %p106_p3 = scmp.ne.s32.totalorder %s436_s10, %s432_s9 }
   0x8   : > { %s597_s17 = smov (%p29_p0, %s27_s17), 0  ;;  %p107_p5 = scmp.eq.s32.totalorder %s304_s16, 1 }
   0x9   : > { %p511_p4 = por %p101_p2, %p100_p1  ;;  %s85_s20 = ssub.s32 %s448_s13, %s597_s17 }
   0xa   : > { %p307_p6 = scmp.ge.s32.totalorder %s452_s14, 1  ;;  %p88_p7 = scmp.eq.s32.totalorder %s85_s20, 0 }
   0xb   : > { %p518_p8 = por %p107_p5, %p106_p3  ;;  %p142_p9 = scmp.lt.s32.totalorder %s452_s14, 3 }
   0xc   : > { %s524_s22 = scalar_select %p88_p7, %s440_s11, %s90_s18  }
   0xd   : > { %p143_p10 = pnand %p307_p6, %p142_p9 }
   0xe   : > { %p170_p11 = scmp.lt.s32.totalorder (!%p143_p10), %s444_s12, 1  ;;  %v454_v0 = vmov (!%p143_p10), 0   ;;  %s167_s3 = sand.u32 (!%p143_p10), 1, %s436_s10   ;;  %v186_v4 = vlaneseq (!%p143_p10) }
   0xf   : > { %146 = sbr.rel (%p143_p10) target bundleno = 178 (0xb2), region = 28  ;;  %373 = vset.pattern.permute.xlu0 (!%p143_p10), %v454_v0  ;;  %s308_s4 = sshll.u32 (!%p143_p10), %s167_s3, 3 }
  0x10   : > { %v187_v7 = vand.u32 (!%p143_p10), 127, %v186_v4  ;;  %s314_s5 = sshll.u32 (!%p143_p10), %s444_s12, 7  ;;  %s169_s6 = scalar_lea.vmem (!%p143_p10), [#allocation2], %s308_s4 }
  0x11   : > { %s220_s7 = sshll.u32 (!%p143_p10), %s169_s6, 4  ;;  %s539_s16 = scalar_lea.hbm (!%p143_p10), %s588_s2, %s314_s5  ;;  %s541_s7 = int_to_ptr.vmem [resolvable:$true] %s220_s7 }
  0x12   : > { %s206_s18 = scalar_lea.sflag (!%p143_p10), [#allocation3], %s167_s3  ;;  %s374_s20 = scalar_lea.vmem (!%p143_p10), %s541_s7, 128 }
  0x13   : > { %p375_p12 = scmp.ne.s32.totalorder (!%p143_p10), %s541_s7, %s374_s20 }
  0x15   : > { %p376_p13 = pnand (!%p143_p10), %p375_p12, %p511_p4 }
  0x16   : > { %s171_s23 = scalar_select %p170_p11, %s444_s12, 1 }
  0x17   : > { %p377_p0 = pneg %p376_p13  ;;  %s455_s12 = smov [#allocation2]  }
  0x18   : > { %s309_s24 = sshll.u32 %s171_s23, 3  ;;  %s378_s23 = sshll.u32 %s455_s12, 4  ;;  %s379_s23 = int_to_ptr.vmem [resolvable:$false] %s378_s23 }
  0x19   : > { %s180_s27 = scalar_lea.vmem %s587_s1, %s309_s24  ;;  %s176_s30 = scalar_lea.vmem %s586_s0, %s309_s24 }
  0x1a   : > { %v184_v1 = vld [vmem:[%s180_s27] sm:$0xff]  ;;  %s380_s24 = scalar_lea.vmem %s379_s23, 256  ;;  %p381_p1 = scmp.lt.s32.totalorder %s541_s7, %s379_s23 }
  0x1b   : > { %191 = vperm.xlu0 %373, %v184_v1   ;;  %vm194_vm0 = vcmp.ne.s32.totalorder %v184_v1, 4294967295  ;;  %v181_v3 = vld [vmem:[%s176_s30] sm:$0xff]  ;;  %p382_p2 = scmp.lt.s32.totalorder %s380_s24, %s374_s20 }
  0x1c   : > { %v195_v2 = vsel %vm194_vm0, 1, %v454_v0  ;;  %v311_v5 = vclamps-f32 %v181_v3, 0.9999999 }
  0x1d   : > { %p383_p3 = por %p382_p2, %p381_p1 }
  0x1e   : > { %v312_v8 = vadd.f32 -0.4, %v311_v5 }
  0x1f   : > { %197 = vperm.xlu0 %373, %v195_v2   ;;  %p384_p5 = pnand %p383_p3, %p377_p0 }
  0x9a   : > { %v192_v6 = vpop.permute.xlu0 %191 }
  0x9b   : > { %vm193_vm1 = vcmp.eq.s32.totalorder %v187_v7, %v192_v6 }
  0x9e   : > { %v198_v9 = vpop.permute.xlu0 %197 }
  0x9f   : > { %vm199_vm2 = vcmp.eq.s32.totalorder %v198_v9, 1 }
  0xa0   : > { %vm200_vm3 = vmand %vm193_vm1, %vm199_vm2 }
  0xa1   : > { %v202_v10 = vsel %vm200_vm3, %v312_v8, %v311_v5 }
  0xa2   : > { %v203_v11 = vmul.f32 64.0, %v202_v10 }
  0xa4   : > { %204 = vst [vmem:[%s169_s6] sm:$0xff] %v203_v11 }
  0xa5   : > { %387 = shalt.err (!%p384_p5)
}
  0xa6   : > { %s388_s25 = scalar_lea.hbm %s539_s16, 128  ;;  %s392_s28 = scalar_lea.hbm %s588_s2, 256 }
  0xa7   : > { %p389_p6 = scmp.ne.s32.totalorder %s539_s16, %s388_s25  ;;  %p393_p10 = scmp.lt.u32.totalorder %s539_s16, %s588_s2 }
  0xa8   : > { %p394_p11 = scmp.lt.u32.totalorder %s392_s28, %s388_s25  ;;  %p396_p13 = scmp.lt.u32.totalorder %s388_s25, %s539_s16 }
  0xa9   : > { %p390_p7 = pnand %p389_p6, %p511_p4 }
  0xaa   : > { %p395_p12 = por %p394_p11, %p393_p10 }
  0xab   : > { %p391_p9 = pneg %p390_p7 }
  0xac   : > { %p397_p0 = por %p396_p13, %p395_p12 }
  0xae   : > { %p398_p1 = pnand %p397_p0, %p391_p9 }
  0xb0   : > { %401 = shalt.err (!%p398_p1)
}
  0xb1   : > { %317 = dma.vmem_to_hbm [thread:$0]  (%p511_p4), %s541_s7, 128, %s539_s16, %s206_s18  }
  0xb2 PF: > { %p323_p2 = scmp.ge.s32.totalorder %s452_s14, 2  ;;  %s232_s3 = sand.u32 1, %s432_s9  }
  0xb3   : > { %s233_s4 = scalar_lea.sflag [#allocation3], %s232_s3 }
  0xb4   : > { %p320_p3 = pnand %p323_p2, %p518_p8 }
  0xb6   : > { %427 = dma.done.wait (!%p320_p3), %s233_s4, 128  }
  0xb7   : > { %429 = vsyncadd (!%p320_p3), %s233_s4, 4294967168  ;;  %s15_s14 = sadd.s32 1, %s452_s14   ;;  %s591_s9 = smov %s436_s10 }
  0xb8   : > { %p12_p5 = scmp.ge.s32.totalorder %s15_s14, 4   ;;  %s592_s10 = smov %s440_s11 }
  0xb9   : > { %s593_s11 = smov %s524_s22  ;;  %s594_s12 = smov %s448_s13 }
  0xba   : > { %s595_s13 = smov %s597_s17  ;;  %14 = sbr.rel (!%p12_p5) target bundleno = 4 (0x4), region = 66 }
  0xc1   :  { %238 = vsyncpa [#allocation3], 1 }
  0xc2   :  { %240 = vsyncpa [#allocation3 + $0x1], 1 }

</bundles_post_ra>
